<compile_context>
chip_gen: v5e
topology: v5e:2x2
jax: 0.10.0
libtpu: 0.0.40
codegen_flags: <defaults>
</compile_context>

<pallas_src>
import math
from functools import partial

import jax
import jax.numpy as jnp
from jax.experimental import pallas as pl
from jax.experimental.pallas import tpu as pltpu


# ----------------------------- helpers ------------------------------------ #

def _round_up(x, m):
    return ((x + m - 1) // m) * m


def _divisor_tile(dim_p, align, max_tile):
    """Largest multiple of `align` that divides dim_p and is <= max_tile.

    dim_p is already a multiple of `align`, so `align` itself always works."""
    best = align
    t = align
    limit = min(dim_p, max_tile)
    while t <= limit:
        if dim_p % t == 0:
            best = t
        t += align
    return best


def _ensure_two_parallel_blocks(Mp, Np, tm, tn):
    """Shrink tn (or tm) so the parallel grid has >= 2 blocks (v7x has 2 TCs)."""
    if (Mp // tm) * (Np // tn) >= 2:
        return tm, tn
    for t in range(tn - 128, 127, -128):   # largest smaller lane-aligned divisor
        if Np % t == 0:
            return tm, t
    for t in range(tm - 8, 7, -8):
        if Mp % t == 0:
            return t, tn
    return tm, tn                          # tiny problem: nothing to split


def _softplus(w):
    # Numerically stable softplus in f32: max(w, 0) + log1p(exp(-|w|)).
    return jnp.log1p(jnp.exp(-jnp.abs(w))) + jnp.maximum(w, 0.0)


# -------------------- in_features == 1 fast path (pure VPU) ---------------- #

def _k1_kernel(x_ref, w_ref, b_ref, o_ref):
    # x: (B, 1), w: (1, N), b: (1, N) -> o: (B, N).  Broadcast multiply-add,
    # no MXU, no padding, single launch (the actual GammaNetwork usage).
    o_ref[...] = x_ref[...] * _softplus(w_ref[...]) + b_ref[...]


def _k1_pallas(x_f, w_row, b_row):
    B = x_f.shape[0]
    N = w_row.shape[1]
    return pl.pallas_call(
        _k1_kernel,
        out_shape=jax.ShapeDtypeStruct((B, N), jnp.float32),
    )(x_f, w_row, b_row)


# ----------------- fused softplus + tiled matmul + bias -------------------- #

def _matmul_bias_kernel(x_ref, w_ref, b_ref, o_ref, *, use_bf16):
    @pl.when(pl.program_id(2) == 0)
    def _init():
        # Fold the bias in at k == 0 instead of a finalize pass.
        o_ref[...] = jnp.broadcast_to(b_ref[...], o_ref.shape)

    w_pos = _softplus(w_ref[...])              # fused softplus (EUP slot)
    xv = x_ref[...]
    if use_bf16:                               # optional v6e/v7x MXU fast path
        xv = xv.astype(jnp.bfloat16)
        w_pos = w_pos.astype(jnp.bfloat16)
    # Accumulate directly into the resident f32 output block.
    o_ref[...] += jnp.dot(xv, w_pos, preferred_element_type=jnp.float32)


def _matmul_bias_pallas(x_p, w_t, bias2d, tm, tn, tk, use_bf16):
    Mp, Kp = x_p.shape
    _, Np = w_t.shape

    # Double-buffered x / w / out / bias tiles; no accumulator scratch.
    vmem_bytes = 4 * (2 * tm * tk + 2 * tk * tn + 2 * tm * tn + 2 * tn)
    # Stay well below every generation's physical VMEM (incl. v7x's 64 MiB/TC).
    vmem_limit = int(min(max(vmem_bytes + (4 << 20), 16 << 20), 48 << 20))

    return pl.pallas_call(
        partial(_matmul_bias_kernel, use_bf16=use_bf16),
        out_shape=jax.ShapeDtypeStruct((Mp, Np), jnp.float32),
        grid_spec=pltpu.PrefetchScalarGridSpec(
            num_scalar_prefetch=0,
            grid=(Mp // tm, Np // tn, Kp // tk),
            in_specs=[
                pl.BlockSpec((tm, tk), lambda i, j, k: (i, k)),   # x tile
                pl.BlockSpec((tk, tn), lambda i, j, k: (k, j)),   # raw W^T tile
                pl.BlockSpec((1, tn), lambda i, j, k: (0, j)),    # bias tile
            ],
            out_specs=pl.BlockSpec((tm, tn), lambda i, j, k: (i, j)),
        ),
        compiler_params=pltpu.CompilerParams(
            dimension_semantics=("parallel", "parallel", "arbitrary"),
            vmem_limit_bytes=vmem_limit),
    )(x_p, w_t, bias2d)


# ------------------------------ wrapper ------------------------------------ #

def positive_linear(x, weight, bias=None, use_bf16_operands=False):
    """x: (..., in_features), weight: (out, in), bias: (out,) -> (..., out)."""
    lead, K = tuple(x.shape[:-1]), x.shape[-1]
    N, Kw = weight.shape
    assert Kw == K
    if bias is None:
        bias = jnp.zeros((N,), dtype=jnp.float32)

    x2 = x.reshape(-1, K).astype(jnp.float32)
    B = x2.shape[0]
    w_f = weight.astype(jnp.float32)
    b_row = bias.astype(jnp.float32).reshape(1, N)

    if K == 1 and B * N * 4 <= (8 << 20):
        # GammaNetwork-style PositiveLinear(1, N): single VPU kernel, no MXU.
        out = _k1_pallas(x2, jnp.transpose(w_f), b_row)
    else:
        # Minimal padding: M -> mult of 8, K/N -> mult of 128.
        Mp, Kp, Np = _round_up(B, 8), _round_up(K, 128), _round_up(N, 128)
        tm = _divisor_tile(Mp, 8, 512)
        tn = _divisor_tile(Np, 128, 1024)
        tk = _divisor_tile(Kp, 128, 1024)
        tm, tn = _ensure_two_parallel_blocks(Mp, Np, tm, tn)

        x_p = x2 if (Mp == B and Kp == K) else jnp.pad(
            x2, ((0, Mp - B), (0, Kp - K)))
        # One-time layout plumbing: (out, in) -> (in, out), zero-pad.  Padded K
        # rows of W^T contribute nothing because the matching x columns are 0.
        w_t = jnp.transpose(w_f)
        if Kp != K or Np != N:
            w_t = jnp.pad(w_t, ((0, Kp - K), (0, Np - N)))
        b_p = b_row if Np == N else jnp.pad(b_row, ((0, 0), (0, Np - N)))

        out = _matmul_bias_pallas(x_p, w_t, b_p, tm, tn, tk,
                                  use_bf16_operands)[:B, :N]

    return out.reshape(lead + (N,)).astype(x.dtype)

# TODO(synk): in a real GammaNetwork forward this layer should be fused with its
# neighbouring sigmoid / concatenation ops; a standalone pallas_call is still
# launch-overhead bound at these tiny shapes.


# ------------------------- parameter init (JAX) ----------------------------- #

def init_positive_linear_params(key, in_features, out_features,
                                weight_init_offset=-2.0):
    """Mirror PositiveLinear.reset_parameters deterministically in JAX."""
    kw, kb = jax.random.split(key)
    fan_in = in_features
    gain = math.sqrt(2.0 / (1.0 + 5.0))                 # kaiming, a=sqrt(5)
    bound_w = gain * math.sqrt(3.0 / fan_in)            # == sqrt(1/fan_in)
    weight = jax.random.uniform(kw, (out_features, in_features),
                                minval=-bound_w, maxval=bound_w,
                                dtype=jnp.float32) + weight_init_offset
    bound_b = 1.0 / math.sqrt(fan_in) if fan_in > 0 else 0.0
    bias = jax.random.uniform(kb, (out_features,),
                              minval=-bound_b, maxval=bound_b,
                              dtype=jnp.float32)
    return weight, bias


# ------------------------------- demo --------------------------------------- #

if __name__ == "__main__":
    key = jax.random.PRNGKey(0)
    k1, k2, k3, k4, k5, k6 = jax.random.split(key, 6)

    # 1) GammaNetwork-style in_features == 1 (VPU fast path, no padding).
    batch = 8
    xg = jax.random.normal(k1, (batch, 1), dtype=jnp.float32)
    wg, bg = init_positive_linear_params(k2, 1, 32)
    out_g = jax.block_until_ready(positive_linear(xg, wg, bg))
    ref_g = xg @ jax.nn.softplus(wg).T + bg[None, :]
    assert out_g.shape == (batch, 32)
    assert jnp.allclose(out_g, ref_g, atol=1e-5, rtol=1e-5), "mismatch (K=1 path)"

    # 2) Small general case (single tile, padding of K/N to 128).
    x = jax.random.normal(k3, (batch, 32), dtype=jnp.float32)
    weight, bias = init_positive_linear_params(k4, 32, 64)
    out = jax.block_until_ready(positive_linear(x, weight, bias))
    ref = x @ jax.nn.softplus(weight).T + bias[None, :]
    assert out.shape == (batch, 64)
    assert jnp.allclose(out, ref, atol=1e-5, rtol=1e-5), "mismatch vs reference"

    # 3) Tiled case: non-power-of-2 dims, multi-step K accumulation, multiple
    #    parallel N blocks (exercises divisor tiling + bias-init accumulator).
    B2, K2, N2 = 96, 1280, 320
    x2 = jax.random.normal(k5, (B2, K2), dtype=jnp.float32)
    w2, b2 = init_positive_linear_params(k6, K2, N2)
    out2 = jax.block_until_ready(positive_linear(x2, w2, b2))
    ref2 = jnp.dot(x2, jax.nn.softplus(w2).T,
                   precision=jax.lax.Precision.HIGHEST) + b2[None, :]
    assert out2.shape == (B2, N2)
    assert jnp.allclose(out2, ref2, atol=1e-4, rtol=1e-4), "mismatch (tiled case)"

    print("KERNEL_OK")
</pallas_src>

<mosaic_0001>
module attributes {stable_mosaic.version = 11 : i64} {
  func.func @_k1_kernel(%arg0: memref<8x1xf32, #tpu.memory_space<vmem>>, %arg1: memref<1x32xf32, #tpu.memory_space<vmem>>, %arg2: memref<1x32xf32, #tpu.memory_space<vmem>>, %arg3: memref<8x32xf32, #tpu.memory_space<vmem>>) attributes {dimension_semantics = [], scalar_prefetch = 0 : i64, scratch_operands = 0 : i64, tpu.core_type = #tpu.core_type<tc>} {
    %c0 = arith.constant 0 : index
    %c0_0 = arith.constant 0 : index
    %0 = vector.load %arg0[%c0, %c0_0] : memref<8x1xf32, #tpu.memory_space<vmem>>, vector<8x1xf32>
    %c0_1 = arith.constant 0 : index
    %c0_2 = arith.constant 0 : index
    %1 = vector.load %arg1[%c0_1, %c0_2] : memref<1x32xf32, #tpu.memory_space<vmem>>, vector<1x32xf32>
    %2 = math.absf %1 : vector<1x32xf32>
    %cst = arith.constant 0.000000e+00 : f32
    %3 = vector.broadcast %cst : f32 to vector<1x32xf32>
    %4 = arith.subf %3, %2 : vector<1x32xf32>
    %5 = math.exp %4 : vector<1x32xf32>
    %6 = math.log1p %5 : vector<1x32xf32>
    %cst_3 = arith.constant 0.000000e+00 : f32
    %7 = vector.broadcast %cst_3 : f32 to vector<1x32xf32>
    %8 = arith.maximumf %1, %7 : vector<1x32xf32>
    %9 = arith.addf %6, %8 : vector<1x32xf32>
    %10 = vector.broadcast %0 : vector<8x1xf32> to vector<8x32xf32>
    %11 = vector.broadcast %9 : vector<1x32xf32> to vector<8x32xf32>
    %12 = arith.mulf %10, %11 : vector<8x32xf32>
    %c0_4 = arith.constant 0 : index
    %c0_5 = arith.constant 0 : index
    %13 = vector.load %arg2[%c0_4, %c0_5] : memref<1x32xf32, #tpu.memory_space<vmem>>, vector<1x32xf32>
    %14 = vector.broadcast %13 : vector<1x32xf32> to vector<8x32xf32>
    %15 = arith.addf %12, %14 : vector<8x32xf32>
    %c0_6 = arith.constant 0 : index
    %c0_7 = arith.constant 0 : index
    %16 = vector.load %arg3[%c0_6, %c0_7] : memref<8x32xf32, #tpu.memory_space<vmem>>, vector<8x32xf32>
    tpu.vector_store %arg3[%c0_6, %c0_7], %15 {strides = array<i32>} : memref<8x32xf32, #tpu.memory_space<vmem>>, vector<8x32xf32>,
    return
  }
}

</mosaic_0001>

<bundles_post_ra>
// kernel: tpu_custom_call.1
= control target key start
LH: loop header
LB: loop body
LE: loop exit
PB: predicated region body
PF: predicated region fallthrough
CT: control target
= control target key end

     0   :  { %v98_v1 = vmov 0   ;;  %s132_s0 = inlined_call_operand.vmem [shape: f32[8,1], index: 0, kind: input, shape index: {}]   ;;  %s133_s1 = inlined_call_operand.vmem [shape: f32[1,32], index: 1, kind: input, shape index: {}]   ;;  %s134_s2 = inlined_call_operand.vmem [shape: f32[1,32], index: 2, kind: input, shape index: {}]   ;;  %s135_s3 = inlined_call_operand.hbm [shape: f32[8,32], index: 3, kind: output, shape index: {}]  }
   0x1   :  { %v15_v0 = vld [vmem:[%s132_s0] sm:$0xff]  ;;  %66 = vset.pattern.permute.xlu0 %v98_v1 }
   0x2   :  { %34 = vperm.xlu0 %66, %v15_v0  }
   0x3   :  { %8 = vsyncpa [#allocation3], 0  ;;  %v16_v2 = vld [vmem:[%s133_s1] sm:$0x1]  ;;  %s99_s16 = smov [#allocation2]   ;;  %s55_s20 = sshll.u32 %s135_s3, 4  ;;  %s56_s20 = int_to_ptr.hbm [resolvable:$true] %s55_s20 }
   0x4   :  { %v17_v3 = vand.u32 2147483647, %v16_v2  ;;  %v30_v14 = vmax.f32 %v16_v2, 0.0  ;;  %v67_v18 = vld [vmem:[%s134_s2] ss:$0 sm:$0xff]  ;;  %s53_s17 = sshll.u32 %s99_s16, 4  ;;  %s54_s17 = int_to_ptr.vmem [resolvable:$true] %s53_s17 }
   0x5   :  { %vm46_vm1 = vcmask 261120  }
   0x6   :  { %v18_v4 = vsub.f32 0.0, %v17_v3 }
   0x8   :  { %v19_v5 = vmul.f32 1.442695, %v18_v4 }
   0xa   :  { %68 = vpow2.f32 %v19_v5 }
  0x10   :  { %v69_v6 = vpop.eup %68 }
  0x11   :  { %v21_v7 = vadd.f32 1.0, %v69_v6  ;;  %v24_v8 = vmul.f32 -0.5, %v69_v6  ;;  %v27_v11 = vand.u32 2147483647, %v69_v6 }
  0x13   :  { %70 = vlog2.f32 %v21_v7  ;;  %v25_v9 = vadd.f32 1.0, %v24_v8  ;;  %vm28_vm0 = vcmp.lt.f32.partialorder %v27_v11, 0.0004427343 }
  0x15   :  { %v26_v13 = vmul.f32 %v69_v6, %v25_v9 }
  0x19   :  { %v71_v10 = vpop.eup %70 }
  0x1a   :  { %v23_v12 = vmul.f32 0.6931472, %v71_v10 }
  0x1c   :  { %v29_v15 = vsel %vm28_vm0, %v26_v13, %v23_v12 }
  0x1d   :  { %v31_v16 = vadd.f32 %v30_v14, %v29_v15 }
  0x1f   :  { %v38_v17 = vperm.slane %v31_v16, 0 }
  0x74   :  { %v35_v19 = vpop.permute.xlu0 %34 }
  0x75   :  { %v40_v20 = vmul.f32 %v38_v17, %v35_v19 }
  0x77   :  { %v45_v21 = vadd.f32 %v67_v18, %v40_v20 }
  0x79   :  { %47 = vst.msk [vmem:[#allocation2] sm:$0xff] %vm46_vm1, %v45_v21 }
  0x7a   :  { %58 = dma.vmem_to_hbm [thread:$0]  %s54_s17, 128, %s56_s20, [#allocation3]  }
  0x7b   :  { %96 = dma.done.wait [#allocation3], 128  }
  0x7c   :  { %97 = vsyncadd [#allocation3], 4294967168 }
  0x7d   :  { %63 = vsyncpa [#allocation3], 1 }

</bundles_post_ra>
